<compile_context>
chip_gen: v5e
topology: v5e:2x2
jax: 0.10.0
libtpu: 0.0.40
codegen_flags: <defaults>
</compile_context>

<pallas_src>
import jax
import jax.numpy as jnp
from jax import lax
from jax.experimental import pallas as pl
from jax.experimental.pallas import tpu as pltpu


def _conv1x1_bn_kernel(x_ref, w_ref, s_ref, b_ref, o_ref):
    # x_ref : (Cin,  T)    compute dtype (bf16)   -- one spatial tile of one image
    # w_ref : (Cout, Cin)  compute dtype
    # s_ref : (Cout, 1)    f32 folded BN scale
    # b_ref : (Cout, 1)    f32 folded BN bias (includes conv bias)
    # o_ref : (Cout, T)    output dtype
    acc = jnp.dot(w_ref[...], x_ref[...], preferred_element_type=jnp.float32)
    o_ref[...] = (acc * s_ref[...] + b_ref[...]).astype(o_ref.dtype)


def _pick_spatial_tile(hw: int, cap: int = 2048) -> int:
    """Largest multiple-of-128 divisor of `hw` that is <= cap (else full hw)."""
    if hw % 128 != 0:
        return hw                       # full-extent block is always legal
    t = (min(cap, hw) // 128) * 128
    while hw % t != 0:
        t -= 128
    return t


def conv1x1_bn(x_nchw, weight, conv_bias, gamma, beta, run_mean, run_var,
               eps=1e-5, compute_dtype=jnp.bfloat16):
    """Conv2d(kernel_size=1, stride=1, bias=True) + BatchNorm2d (inference).

    x_nchw: (N, Cin, H, W); weight: (Cout, Cin, 1, 1)  ->  (N, Cout, H, W)
    """
    N, Cin, H, W = x_nchw.shape
    Cout = weight.shape[0]
    HW = H * W
    out_dtype = x_nchw.dtype

    # Fold BN (inference) + conv bias into per-channel scale / bias (f32).
    scale = (gamma / jnp.sqrt(run_var + eps)).astype(jnp.float32)        # (Cout,)
    bias = (beta + (conv_bias - run_mean) * scale).astype(jnp.float32)   # (Cout,)
    scale2d = scale.reshape(Cout, 1)
    bias2d = bias.reshape(Cout, 1)

    # Free reshapes only: keep NCHW layout; no transpose, no pad, one HBM read.
    x_flat = x_nchw.reshape(N, Cin, HW).astype(compute_dtype)
    w_mat = weight.reshape(Cout, Cin).astype(compute_dtype)

    T = _pick_spatial_tile(HW)
    grid = (N, HW // T)

    comp_bytes = jnp.dtype(compute_dtype).itemsize
    out_bytes = jnp.dtype(out_dtype).itemsize
    cost = pl.CostEstimate(
        flops=2 * N * HW * Cin * Cout,
        transcendentals=0,
        bytes_accessed=(N * HW * Cin * comp_bytes
                        + N * HW * Cout * out_bytes
                        + Cout * Cin * comp_bytes
                        + 2 * Cout * 4),
    )

    out_flat = pl.pallas_call(
        _conv1x1_bn_kernel,
        out_shape=jax.ShapeDtypeStruct((N, Cout, HW), out_dtype),
        grid_spec=pltpu.PrefetchScalarGridSpec(
            num_scalar_prefetch=0,
            grid=grid,
            in_specs=[
                # batch dim squeezed out; spatial tile on the lane axis.
                pl.BlockSpec((None, Cin, T), lambda n, t: (n, 0, t)),
                pl.BlockSpec((Cout, Cin), lambda n, t: (0, 0)),
                pl.BlockSpec((Cout, 1), lambda n, t: (0, 0)),
                pl.BlockSpec((Cout, 1), lambda n, t: (0, 0)),
            ],
            out_specs=pl.BlockSpec((None, Cout, T), lambda n, t: (n, 0, t)),
        ),
        compiler_params=pltpu.CompilerParams(
            dimension_semantics=("parallel", "parallel")),
        cost_estimate=cost,
    )(x_flat, w_mat, scale2d, bias2d)

    return out_flat.reshape(N, Cout, H, W)


def _reference(x, weight, conv_bias, gamma, beta, run_mean, run_var,
               eps=1e-5, compute_dtype=jnp.bfloat16):
    # Same bf16-input / f32-accumulation numerics as the kernel.
    y = lax.conv_general_dilated(
        x.astype(compute_dtype), weight.astype(compute_dtype),
        window_strides=(1, 1), padding="VALID",
        dimension_numbers=("NCHW", "OIHW", "NCHW"),
        preferred_element_type=jnp.float32)
    y = y + conv_bias.reshape(1, -1, 1, 1)
    y = (y - run_mean.reshape(1, -1, 1, 1)) / jnp.sqrt(
        run_var.reshape(1, -1, 1, 1) + eps)
    y = y * gamma.reshape(1, -1, 1, 1) + beta.reshape(1, -1, 1, 1)
    return y.astype(x.dtype)


if __name__ == "__main__":
    key = jax.random.PRNGKey(0)
    N, Cin, Cout, H, W = 2, 4, 8, 16, 16

    k1, k2, k3, k4, k5, k6, k7 = jax.random.split(key, 7)
    x = jax.random.normal(k1, (N, Cin, H, W), jnp.float32)
    weight = jax.random.normal(k2, (Cout, Cin, 1, 1), jnp.float32) * 0.1
    conv_bias = jax.random.normal(k3, (Cout,), jnp.float32) * 0.1
    gamma = 1.0 + 0.1 * jax.random.normal(k4, (Cout,), jnp.float32)
    beta = 0.1 * jax.random.normal(k5, (Cout,), jnp.float32)
    run_mean = 0.1 * jax.random.normal(k6, (Cout,), jnp.float32)
    run_var = jnp.abs(1.0 + 0.1 * jax.random.normal(k7, (Cout,), jnp.float32))

    out = conv1x1_bn(x, weight, conv_bias, gamma, beta, run_mean, run_var)
    out = jax.block_until_ready(out)

    ref = _reference(x, weight, conv_bias, gamma, beta, run_mean, run_var)
    assert out.shape == (N, Cout, H, W)
    assert jnp.allclose(out, ref, atol=2e-3, rtol=2e-3), "mismatch vs reference"

    print("KERNEL_OK")
</pallas_src>

<mosaic_0001>
module attributes {stable_mosaic.version = 11 : i64} {
  func.func @_conv1x1_bn_kernel(%arg0: i32, %arg1: i32, %arg2: memref<1x4x256xbf16, #tpu.memory_space<vmem>>, %arg3: memref<8x4xbf16, #tpu.memory_space<vmem>>, %arg4: memref<8x1xf32, #tpu.memory_space<vmem>>, %arg5: memref<8x1xf32, #tpu.memory_space<vmem>>, %arg6: memref<1x8x256xf32, #tpu.memory_space<vmem>>) attributes {dimension_semantics = [#tpu.dimension_semantics<parallel>, #tpu.dimension_semantics<parallel>], iteration_bounds = array<i64: 2, 1>, scalar_prefetch = 0 : i64, scratch_operands = 0 : i64, tpu.core_type = #tpu.core_type<tc>, window_params = [{transform_indices = @transform_0, window_bounds = array<i64: 1, 4, 256>}, {pipeline_mode = #tpu.pipeline_mode<synchronous>, transform_indices = @transform_1, window_bounds = array<i64: 8, 4>}, {pipeline_mode = #tpu.pipeline_mode<synchronous>, transform_indices = @transform_2, window_bounds = array<i64: 8, 1>}, {pipeline_mode = #tpu.pipeline_mode<synchronous>, transform_indices = @transform_3, window_bounds = array<i64: 8, 1>}, {transform_indices = @transform_4, window_bounds = array<i64: 1, 8, 256>}]} {
    %c0 = arith.constant 0 : index
    %c0_0 = arith.constant 0 : index
    %0 = vector.load %arg3[%c0, %c0_0] : memref<8x4xbf16, #tpu.memory_space<vmem>>, vector<8x4xbf16>
    %c0_1 = arith.constant 0 : index
    %c0_2 = arith.constant 0 : index
    %c0_3 = arith.constant 0 : index
    %1 = vector.load %arg2[%c0_1, %c0_2, %c0_3] : memref<1x4x256xbf16, #tpu.memory_space<vmem>>, vector<1x4x256xbf16>
    %2 = vector.shape_cast %1 : vector<1x4x256xbf16> to vector<4x256xbf16>
    %cst = arith.constant dense<0.000000e+00> : vector<8x256xf32>
    %3 = tpu.matmul %0, %2, %cst {dimension_numbers = #tpu.dot_dimension_numbers<[1], [0], [0], [1], [0, 0, 1, 1], [], []>} : vector<8x4xbf16>, vector<4x256xbf16>, vector<8x256xf32> -> vector<8x256xf32>
    %c0_4 = arith.constant 0 : index
    %c0_5 = arith.constant 0 : index
    %4 = vector.load %arg4[%c0_4, %c0_5] : memref<8x1xf32, #tpu.memory_space<vmem>>, vector<8x1xf32>
    %5 = vector.broadcast %4 : vector<8x1xf32> to vector<8x256xf32>
    %6 = arith.mulf %3, %5 : vector<8x256xf32>
    %c0_6 = arith.constant 0 : index
    %c0_7 = arith.constant 0 : index
    %7 = vector.load %arg5[%c0_6, %c0_7] : memref<8x1xf32, #tpu.memory_space<vmem>>, vector<8x1xf32>
    %8 = vector.broadcast %7 : vector<8x1xf32> to vector<8x256xf32>
    %9 = arith.addf %6, %8 : vector<8x256xf32>
    %c0_8 = arith.constant 0 : index
    %c0_9 = arith.constant 0 : index
    %c0_10 = arith.constant 0 : index
    %10 = vector.load %arg6[%c0_8, %c0_9, %c0_10] : memref<1x8x256xf32, #tpu.memory_space<vmem>>, vector<1x8x256xf32>
    %11 = vector.shape_cast %10 : vector<1x8x256xf32> to vector<8x256xf32>
    %12 = vector.shape_cast %9 : vector<8x256xf32> to vector<1x8x256xf32>
    tpu.vector_store %arg6[%c0_8, %c0_9, %c0_10], %12 {strides = array<i32>} : memref<1x8x256xf32, #tpu.memory_space<vmem>>, vector<1x8x256xf32>,
    return
  }
  func.func @transform_0(%arg0: i32, %arg1: i32) -> (i32, i32, i32) {
    %c0_i32 = arith.constant 0 : i32
    %c0_i32_0 = arith.constant 0 : i32
    return %arg0, %c0_i32, %arg1 : i32, i32, i32
  }
  func.func @transform_1(%arg0: i32, %arg1: i32) -> (i32, i32) {
    %c0_i32 = arith.constant 0 : i32
    %c0_i32_0 = arith.constant 0 : i32
    %c0_i32_1 = arith.constant 0 : i32
    return %c0_i32, %c0_i32_0 : i32, i32
  }
  func.func @transform_2(%arg0: i32, %arg1: i32) -> (i32, i32) {
    %c0_i32 = arith.constant 0 : i32
    %c0_i32_0 = arith.constant 0 : i32
    %c0_i32_1 = arith.constant 0 : i32
    return %c0_i32, %c0_i32_0 : i32, i32
  }
  func.func @transform_3(%arg0: i32, %arg1: i32) -> (i32, i32) {
    %c0_i32 = arith.constant 0 : i32
    %c0_i32_0 = arith.constant 0 : i32
    %c0_i32_1 = arith.constant 0 : i32
    return %c0_i32, %c0_i32_0 : i32, i32
  }
  func.func @transform_4(%arg0: i32, %arg1: i32) -> (i32, i32, i32) {
    %c0_i32 = arith.constant 0 : i32
    %c0_i32_0 = arith.constant 0 : i32
    return %arg0, %c0_i32, %arg1 : i32, i32, i32
  }
}

</mosaic_0001>

<bundles_post_ra>
// kernel: tpu_custom_call.1
= control target key start
LH: loop header
LB: loop body
LE: loop exit
PB: predicated region body
PF: predicated region fallthrough
CT: control target
= control target key end

     0   :  { %9 = vsyncpa [#allocation3], 0  ;;  %s668_s0 = inlined_call_operand.vmem [shape: bf16[2,4,256], index: 0, kind: input, shape index: {}]   ;;  %s669_s1 = inlined_call_operand.vmem [shape: bf16[8,4], index: 1, kind: input, shape index: {}]   ;;  %s670_s2 = inlined_call_operand.vmem [shape: f32[8,1], index: 2, kind: input, shape index: {}]   ;;  %s671_s3 = inlined_call_operand.vmem [shape: f32[8,1], index: 3, kind: input, shape index: {}]   ;;  %s672_s4 = inlined_call_operand.hbm [shape: f32[2,8,256], index: 4, kind: output, shape index: {}]  }
   0x1   :  { %11 = vsyncpa [#allocation3 + $0x1], 0  ;;  %s562_s15 = smov 0   ;;  %s564_s16 = smov 0  }
   0x2   :  { %s566_s17 = smov 0   ;;  %s568_s18 = smov 0  }
   0x3   :  { %s570_s19 = smov 0   ;;  %s572_s20 = smov 0  }
   0x4 LB: > { %s382_s21 = sadd.s32 4294967295, %s534_s20   ;;  %s383_s22 = sadd.s32 4294967294, %s534_s20   ;;  %s534_s20 = sphi %s572_s20, %s17_s20   ;;  %s530_s19 = sphi %s570_s19, %s679_s19   ;;  %s526_s18 = sphi %s568_s18, %s678_s18   ;;  %s522_s17 = sphi %s566_s17, %s677_s17   ;;  %s518_s16 = sphi %s564_s16, %s676_s16   ;;  %s514_s15 = sphi %s562_s15, %s675_s15  }
   0x5   : > { %s29_s23 = sadd.s32 1, %s530_s19  ;;  %s129_s24 = sadd.s32 1, %s522_s17 }
   0x6   : > { %p31_p0 = scmp.ge.s32.totalorder %s29_s23, 2  ;;  %p139_p1 = scmp.ne.s32.totalorder %s522_s17, %s518_s16 }
   0x7   : > { %p140_p2 = scmp.eq.s32.totalorder %s382_s21, 1  ;;  %p145_p3 = scmp.ne.s32.totalorder %s518_s16, %s514_s15 }
   0x8   : > { %s681_s23 = smov (%p31_p0, %s29_s23), 0  ;;  %p146_p5 = scmp.eq.s32.totalorder %s383_s22, 1 }
   0x9   : > { %p602_p4 = por %p140_p2, %p139_p1  ;;  %s124_s26 = ssub.s32 %s530_s19, %s681_s23 }
   0xa   : > { %p386_p6 = scmp.ge.s32.totalorder %s534_s20, 1  ;;  %p127_p7 = scmp.eq.s32.totalorder %s124_s26, 0 }
   0xb   : > { %p609_p8 = por %p146_p5, %p145_p3  ;;  %p186_p9 = scmp.lt.s32.totalorder %s534_s20, 3 }
   0xc   : > { %s615_s28 = scalar_select %p127_p7, %s522_s17, %s129_s24  }
   0xd   : > { %p187_p10 = pnand %p386_p6, %p186_p9 }
   0xe   : > { %p217_p11 = scmp.lt.s32.totalorder (!%p187_p10), %s526_s18, 1  ;;  %s213_s14 = sand.u32 (!%p187_p10), 1, %s518_s16  }
   0xf   : > { %190 = sbr.rel (%p187_p10) target bundleno = 171 (0xab), region = 36  ;;  %s387_s21 = sshll.u32 (!%p187_p10), %s213_s14, 4 }
  0x10   : > { %s398_s22 = sshll.u32 (!%p187_p10), %s526_s18, 4  ;;  %s215_s30 = scalar_lea.vmem (!%p187_p10), [#allocation2], %s387_s21 }
  0x11   : > { %s301_s29 = scalar_lea.hbm (!%p187_p10), %s672_s4, %s398_s22  ;;  %s476_s11 = scalar_lea.hbm (!%p187_p10), %s672_s4, 32 }
  0x14   : > { %v269_v0 = vld [vmem:[%s670_s2] sm:$0xff]  ;;  %v536_v1 = vmov 0   ;;  %s218_s5 = scalar_select %p217_p11, %s526_s18, 1  ;;  %vm238_vm0 = vcmask 1041408   ;;  %vm234_vm1 = vcmask 31744  }
  0x15   : > { %455 = vset.pattern.permute.xlu0 %v536_v1  ;;  %v277_v3 = vld [vmem:[%s671_s3] sm:$0xff]  ;;  %s288_s18 = scalar_lea.sflag [#allocation3], %s213_s14 }
  0x16   : > { %272 = vperm.xlu0 %455, %v269_v0   ;;  %s397_s6 = sshll.u32 %s218_s5, 2  ;;  %v228_v8 = vld [vmem:[%s669_s1] sm:$0xf]  ;;  %s303_s5 = sshll.u32 %s215_s30, 4  ;;  %s304_s5 = int_to_ptr.vmem [resolvable:$true] %s303_s5 }
  0x17   : > { %s224_s9 = scalar_lea.vmem %s668_s0, %s397_s6  ;;  %s305_s6 = sshll.u32 %s301_s29, 4  ;;  %s306_s6 = int_to_ptr.hbm [resolvable:$true] %s305_s6 }
  0x18   : > { %v229_v2 = vld [vmem:[%s224_s9] sm:$0xf]  ;;  %s470_s7 = sshra.s32 %s306_s6, 4  ;;  %s471_s7 = int_to_ptr.hbm [resolvable:$true] %s470_s7 }
  0x19   : > { %231 = vst [vmem:[#allocation1] ss:$4 sm:$0xff] %v229_v2  ;;  %s472_s8 = scalar_lea.hbm %s471_s7, 16  ;;  %p477_p1 = scmp.lt.s32.totalorder %s471_s7, %s672_s4 }
  0x1a   : > { %p473_p12 = scmp.ne.s32.totalorder %s471_s7, %s472_s8  ;;  %p478_p2 = scmp.lt.s32.totalorder %s476_s11, %s472_s8 }
  0x1c   : > { %p474_p13 = pnand %p473_p12, %p602_p4  ;;  %p479_p3 = por %p478_p2, %p477_p1 }
  0x1e   : > { %280 = vperm.xlu0 %455, %v277_v3   ;;  %p475_p0 = pneg %p474_p13 }
  0x20   : > { %v232_v4 = vld.sshfl [vmem:[#allocation1] sm:$0xff pattern:$0x73625140]  ;;  %v233_v5 = vld.sshfl [vmem:[#allocation1 + $0x8] sm:$0xff pattern:$0x73625140]  ;;  %p480_p5 = pnand %p479_p3, %p475_p0 }
  0x21   : > { %v239_v6 = vsel %vm238_vm0, %v232_v4, 0  ;;  %v241_v7 = vsel %vm238_vm0, %v233_v5, 0 }
  0x22   : > { %250 = vmatpush.bf16.msra.mxu0 %v239_v6  ;;  %263 = vmatpush.bf16.msra.mxu1 %v241_v7 }
  0x25   : > { %390 = vmatmul.msk.bf16.vlgmr.msra.gmra.mxu0 %vm234_vm1, %v228_v8  ;;  %391 = vmatmul.msk.bf16.vlgmr.msra.gmra.mxu1 %vm234_vm1, %v228_v8 }
  0x88   : > { %v273_v9 = vpop.permute.xlu0 %272 }
  0x90   : > { %v281_v14 = vpop.permute.xlu0 %280 }
  0xa2   : > { %v252_v10 = vpop.f32.mrf.mxu0  ;;  %v265_v11 = vpop.f32.mrf.mxu1 }
  0xa3   : > { %v275_v12 = vmul.f32 %v273_v9, %v252_v10  ;;  %v276_v13 = vmul.f32 %v273_v9, %v265_v11 }
  0xa5   : > { %v283_v15 = vadd.f32 %v281_v14, %v275_v12  ;;  %v284_v16 = vadd.f32 %v281_v14, %v276_v13 }
  0xa7   : > { %285 = vst [vmem:[%s215_s30] sm:$0xff] %v283_v15 }
  0xa8   : > { %286 = vst [vmem:[%s215_s30 + $0x8] sm:$0xff] %v284_v16 }
  0xa9   : > { %483 = shalt.err (!%p480_p5)
}
  0xaa   : > { %399 = dma.vmem_to_hbm [thread:$0]  (%p602_p4), %s304_s5, 256, %s306_s6, %s288_s18   ;;  %v254_v17 = vpop.f32.mrf.mxu0  ;;  %v267_v18 = vpop.f32.mrf.mxu1 }
  0xab PF: > { %p405_p6 = scmp.ge.s32.totalorder %s534_s20, 2  ;;  %s317_s14 = sand.u32 1, %s514_s15  }
  0xac   : > { %s318_s21 = scalar_lea.sflag [#allocation3], %s317_s14 }
  0xad   : > { %p402_p7 = pnand %p405_p6, %p609_p8 }
  0xaf   : > { %p403_p9 = pneg %p402_p7 }
  0xb1   : > { %509 = dma.done.wait (%p403_p9), %s318_s21, 256  }
  0xb2   : > { %511 = vsyncadd (%p403_p9), %s318_s21, 4294967040  ;;  %s17_s20 = sadd.s32 1, %s534_s20   ;;  %s675_s15 = smov %s518_s16 }
  0xb3   : > { %p14_p10 = scmp.ge.s32.totalorder %s17_s20, 4   ;;  %s676_s16 = smov %s522_s17 }
  0xb4   : > { %s677_s17 = smov %s615_s28  ;;  %s678_s18 = smov %s530_s19 }
  0xb5   : > { %s679_s19 = smov %s681_s23  ;;  %16 = sbr.rel (!%p14_p10) target bundleno = 4 (0x4), region = 71 }
  0xba   :  { %324 = vsyncpa [#allocation3], 1 }
  0xbb   :  { %326 = vsyncpa [#allocation3 + $0x1], 1 }

</bundles_post_ra>
